<compile_context>
chip_gen: v7x
topology: tpu7x:2x2x1
jax: 0.10.0
libtpu: 0.0.40
codegen_flags: <defaults>
</compile_context>

<pallas_src>
import jax
import jax.numpy as jnp
from jax.experimental import pallas as pl
from jax.experimental.pallas import tpu as pltpu


NUM_HIDDEN = 4  # number of Linear+ReLU blocks in net2 (fixed by the module)


def _round_up(n, m):
    return ((n + m - 1) // m) * m


def boosting_kernel(x_ref, t_ref,
                    w1x_ref, w1t_ref, b1_ref,
                    w2_ref, b2_ref,
                    w3_ref, b3_ref,
                    out_ref):
    """One batch tile: (TM, D) x + (TM, T) time -> (TM, OUT_PAD) output."""
    # net1: Linear(data_dim+time_dim -> H), no activation.  The torch hstack is
    # replaced by two dots against the split first-layer weight (no HBM concat).
    h = (jnp.dot(x_ref[...].astype(jnp.bfloat16), w1x_ref[...],
                 preferred_element_type=jnp.float32)
         + jnp.dot(t_ref[...].astype(jnp.bfloat16), w1t_ref[...],
                   preferred_element_type=jnp.float32)
         + b1_ref[...])

    # net2: 4 x (Linear + ReLU); weights stacked (4, H, H), biases (4, 1, H).
    for l in range(NUM_HIDDEN):
        h = (jnp.dot(h.astype(jnp.bfloat16), w2_ref[l, :, :],
                     preferred_element_type=jnp.float32)
             + b2_ref[l, :, :])
        h = jnp.maximum(h, 0.0)

    # net3: Linear(H -> data_dim), zero-padded to a lane-dense 128-wide output.
    out_ref[...] = (jnp.dot(h.astype(jnp.bfloat16), w3_ref[...],
                            preferred_element_type=jnp.float32)
                    + b3_ref[...]).astype(out_ref.dtype)


def pack_params(params, data_dim):
    """One-time weight packing: split W1, stack net2, pad net3, cast MXU operands to bf16."""
    out_dim = params["w3"].shape[1]
    out_pad = _round_up(max(out_dim, 1), 128)
    w1 = params["w1"]
    return {
        "w1x": w1[:data_dim].astype(jnp.bfloat16),                    # (D, H)
        "w1t": w1[data_dim:].astype(jnp.bfloat16),                    # (T, H)
        "b1": params["b1"].astype(jnp.float32),                       # (1, H)
        "w2": jnp.stack([params[f"w2_{i}"] for i in range(NUM_HIDDEN)]
                        ).astype(jnp.bfloat16),                       # (4, H, H)
        "b2": jnp.stack([params[f"b2_{i}"] for i in range(NUM_HIDDEN)]
                        ).astype(jnp.float32),                        # (4, 1, H)
        "w3": jnp.pad(params["w3"], ((0, 0), (0, out_pad - out_dim))
                      ).astype(jnp.bfloat16),                         # (H, out_pad)
        "b3": jnp.pad(params["b3"], ((0, 0), (0, out_pad - out_dim))
                      ).astype(jnp.float32),                          # (1, out_pad)
    }


def boosting_forward(x, time, packed, *, tm=256):
    """x: (B, data_dim) f32, time: (B, time_dim) f32 -> (B, data_dim) f32."""
    B, data_dim = x.shape
    time_dim = time.shape[1]
    H = packed["w1x"].shape[1]
    out_pad = packed["w3"].shape[1]
    out_dim = data_dim  # net3 maps back to data_dim

    # torch forward() does hstack([x, time.long()]): truncate the time feature.
    t = jnp.trunc(time).astype(jnp.float32)

    # Batch tile: fill the MXU M dim on real batches (256 for v6e/v7x, also fine
    # on v5e); clamp to a multiple of 8 for tiny batches to avoid wasted padding.
    tm = min(tm, _round_up(B, 8))
    B_pad = _round_up(B, tm)
    if B_pad != B:
        x = jnp.pad(x, ((0, B_pad - B), (0, 0)))
        t = jnp.pad(t, ((0, B_pad - B), (0, 0)))

    grid_spec = pltpu.PrefetchScalarGridSpec(
        num_scalar_prefetch=0,
        grid=(B_pad // tm,),
        in_specs=[
            pl.BlockSpec((tm, data_dim), lambda i: (i, 0)),          # x tile
            pl.BlockSpec((tm, time_dim), lambda i: (i, 0)),          # time tile
            pl.BlockSpec((data_dim, H), lambda i: (0, 0)),           # W1[:data_dim]
            pl.BlockSpec((time_dim, H), lambda i: (0, 0)),           # W1[data_dim:]
            pl.BlockSpec((1, H), lambda i: (0, 0)),                  # b1
            pl.BlockSpec((NUM_HIDDEN, H, H), lambda i: (0, 0, 0)),   # stacked net2 W
            pl.BlockSpec((NUM_HIDDEN, 1, H), lambda i: (0, 0, 0)),   # stacked net2 b
            pl.BlockSpec((H, out_pad), lambda i: (0, 0)),            # W3 (lane-padded)
            pl.BlockSpec((1, out_pad), lambda i: (0, 0)),            # b3 (lane-padded)
        ],
        out_specs=pl.BlockSpec((tm, out_pad), lambda i: (i, 0)),
    )

    out = pl.pallas_call(
        boosting_kernel,
        out_shape=jax.ShapeDtypeStruct((B_pad, out_pad), jnp.float32),
        grid_spec=grid_spec,
        compiler_params=pltpu.CompilerParams(
            dimension_semantics=("parallel",)),   # shard batch tiles across TCs
    )(x, t,
      packed["w1x"], packed["w1t"], packed["b1"],
      packed["w2"], packed["b2"],
      packed["w3"], packed["b3"])

    return out[:B, :out_dim]


def init_params(key, data_dim, time_dim, hidden_dim):
    """Deterministic init matching nn.Linear's default (uniform +- 1/sqrt(fan_in))."""
    def linear(k, fan_in, fan_out):
        kw, kb = jax.random.split(k)
        bound = 1.0 / jnp.sqrt(float(fan_in))
        w = jax.random.uniform(kw, (fan_in, fan_out), jnp.float32, -bound, bound)
        b = jax.random.uniform(kb, (1, fan_out), jnp.float32, -bound, bound)
        return w, b

    keys = jax.random.split(key, 2 + NUM_HIDDEN)
    params = {}
    params["w1"], params["b1"] = linear(keys[0], data_dim + time_dim, hidden_dim)
    for i in range(NUM_HIDDEN):
        w, b = linear(keys[1 + i], hidden_dim, hidden_dim)
        params[f"w2_{i}"], params[f"b2_{i}"] = w, b
    params["w3"], params["b3"] = linear(keys[1 + NUM_HIDDEN], hidden_dim, data_dim)
    return params


def boosting_reference(x, time, params):
    """Pure-JAX reference mirroring the kernel's bf16-MXU / f32-accumulate numerics."""
    dd = x.shape[1]
    t = jnp.trunc(time).astype(jnp.float32)
    w1 = params["w1"].astype(jnp.bfloat16)
    h = (jnp.dot(x.astype(jnp.bfloat16), w1[:dd], preferred_element_type=jnp.float32)
         + jnp.dot(t.astype(jnp.bfloat16), w1[dd:], preferred_element_type=jnp.float32)
         + params["b1"])
    for i in range(NUM_HIDDEN):
        h = (jnp.dot(h.astype(jnp.bfloat16),
                     params[f"w2_{i}"].astype(jnp.bfloat16),
                     preferred_element_type=jnp.float32)
             + params[f"b2_{i}"])
        h = jnp.maximum(h, 0.0)
    return (jnp.dot(h.astype(jnp.bfloat16), params["w3"].astype(jnp.bfloat16),
                    preferred_element_type=jnp.float32)
            + params["b3"])


if __name__ == "__main__":
    data_dim, time_dim, hidden_dim = 2, 2, 128
    batch = 8

    key = jax.random.PRNGKey(0)
    k_params, k_x, k_t = jax.random.split(key, 3)

    params = init_params(k_params, data_dim, time_dim, hidden_dim)
    x = jax.random.normal(k_x, (batch, data_dim), jnp.float32)
    # forward() uses time.long() as a (B, time_dim) feature: integer DDPM timesteps.
    time = jax.random.randint(k_t, (batch, time_dim), 0, 1000).astype(jnp.float32)

    packed = pack_params(params, data_dim)
    out = boosting_forward(x, time, packed)
    out = jax.block_until_ready(out)

    ref = boosting_reference(x, time, params)
    assert out.shape == (batch, data_dim)
    assert jnp.allclose(out, ref, atol=1e-3, rtol=1e-3), float(jnp.max(jnp.abs(out - ref)))

    print("KERNEL_OK")
</pallas_src>

<mosaic_0001>
module attributes {stable_mosaic.version = 11 : i64} {
  func.func @boosting_kernel(%arg0: i32, %arg1: memref<8x2xf32, #tpu.memory_space<vmem>>, %arg2: memref<8x2xf32, #tpu.memory_space<vmem>>, %arg3: memref<2x128xbf16, #tpu.memory_space<vmem>>, %arg4: memref<2x128xbf16, #tpu.memory_space<vmem>>, %arg5: memref<1x128xf32, #tpu.memory_space<vmem>>, %arg6: memref<4x128x128xbf16, #tpu.memory_space<vmem>>, %arg7: memref<4x1x128xf32, #tpu.memory_space<vmem>>, %arg8: memref<128x128xbf16, #tpu.memory_space<vmem>>, %arg9: memref<1x128xf32, #tpu.memory_space<vmem>>, %arg10: memref<8x128xf32, #tpu.memory_space<vmem>>) attributes {dimension_semantics = [#tpu.dimension_semantics<parallel>], iteration_bounds = array<i64: 1>, scalar_prefetch = 0 : i64, scratch_operands = 0 : i64, tpu.core_type = #tpu.core_type<tc>, window_params = [{transform_indices = @transform_0, window_bounds = array<i64: 8, 2>}, {transform_indices = @transform_1, window_bounds = array<i64: 8, 2>}, {pipeline_mode = #tpu.pipeline_mode<synchronous>, transform_indices = @transform_2, window_bounds = array<i64: 2, 128>}, {pipeline_mode = #tpu.pipeline_mode<synchronous>, transform_indices = @transform_3, window_bounds = array<i64: 2, 128>}, {pipeline_mode = #tpu.pipeline_mode<synchronous>, transform_indices = @transform_4, window_bounds = array<i64: 1, 128>}, {pipeline_mode = #tpu.pipeline_mode<synchronous>, transform_indices = @transform_5, window_bounds = array<i64: 4, 128, 128>}, {pipeline_mode = #tpu.pipeline_mode<synchronous>, transform_indices = @transform_6, window_bounds = array<i64: 4, 1, 128>}, {pipeline_mode = #tpu.pipeline_mode<synchronous>, transform_indices = @transform_7, window_bounds = array<i64: 128, 128>}, {pipeline_mode = #tpu.pipeline_mode<synchronous>, transform_indices = @transform_8, window_bounds = array<i64: 1, 128>}, {transform_indices = @transform_9, window_bounds = array<i64: 8, 128>}]} {
    %c0 = arith.constant 0 : index
    %c0_0 = arith.constant 0 : index
    %0 = vector.load %arg1[%c0, %c0_0] : memref<8x2xf32, #tpu.memory_space<vmem>>, vector<8x2xf32>
    %1 = arith.truncf %0 : vector<8x2xf32> to vector<8x2xbf16>
    %c0_1 = arith.constant 0 : index
    %c0_2 = arith.constant 0 : index
    %2 = vector.load %arg3[%c0_1, %c0_2] : memref<2x128xbf16, #tpu.memory_space<vmem>>, vector<2x128xbf16>
    %cst = arith.constant dense<0.000000e+00> : vector<8x128xf32>
    %3 = tpu.matmul %1, %2, %cst {dimension_numbers = #tpu.dot_dimension_numbers<[1], [0], [0], [1], [0, 0, 1, 1], [], []>} : vector<8x2xbf16>, vector<2x128xbf16>, vector<8x128xf32> -> vector<8x128xf32>
    %c0_3 = arith.constant 0 : index
    %c0_4 = arith.constant 0 : index
    %4 = vector.load %arg2[%c0_3, %c0_4] : memref<8x2xf32, #tpu.memory_space<vmem>>, vector<8x2xf32>
    %5 = arith.truncf %4 : vector<8x2xf32> to vector<8x2xbf16>
    %c0_5 = arith.constant 0 : index
    %c0_6 = arith.constant 0 : index
    %6 = vector.load %arg4[%c0_5, %c0_6] : memref<2x128xbf16, #tpu.memory_space<vmem>>, vector<2x128xbf16>
    %cst_7 = arith.constant dense<0.000000e+00> : vector<8x128xf32>
    %7 = tpu.matmul %5, %6, %cst_7 {dimension_numbers = #tpu.dot_dimension_numbers<[1], [0], [0], [1], [0, 0, 1, 1], [], []>} : vector<8x2xbf16>, vector<2x128xbf16>, vector<8x128xf32> -> vector<8x128xf32>
    %8 = arith.addf %3, %7 : vector<8x128xf32>
    %c0_8 = arith.constant 0 : index
    %c0_9 = arith.constant 0 : index
    %9 = vector.load %arg5[%c0_8, %c0_9] : memref<1x128xf32, #tpu.memory_space<vmem>>, vector<1x128xf32>
    %10 = vector.broadcast %9 : vector<1x128xf32> to vector<8x128xf32>
    %11 = arith.addf %8, %10 : vector<8x128xf32>
    %12 = arith.truncf %11 : vector<8x128xf32> to vector<8x128xbf16>
    %c0_10 = arith.constant 0 : index
    %c0_11 = arith.constant 0 : index
    %c0_12 = arith.constant 0 : index
    %13 = vector.load %arg6[%c0_10, %c0_11, %c0_12] : memref<4x128x128xbf16, #tpu.memory_space<vmem>>, vector<1x128x128xbf16>
    %14 = vector.shape_cast %13 : vector<1x128x128xbf16> to vector<128x128xbf16>
    %cst_13 = arith.constant dense<0.000000e+00> : vector<8x128xf32>
    %15 = tpu.matmul %12, %14, %cst_13 {dimension_numbers = #tpu.dot_dimension_numbers<[1], [0], [0], [1], [0, 0, 1, 1], [], []>} : vector<8x128xbf16>, vector<128x128xbf16>, vector<8x128xf32> -> vector<8x128xf32>
    %c0_14 = arith.constant 0 : index
    %c0_15 = arith.constant 0 : index
    %c0_16 = arith.constant 0 : index
    %16 = vector.load %arg7[%c0_14, %c0_15, %c0_16] : memref<4x1x128xf32, #tpu.memory_space<vmem>>, vector<1x1x128xf32>
    %17 = vector.shape_cast %16 : vector<1x1x128xf32> to vector<1x128xf32>
    %18 = vector.broadcast %17 : vector<1x128xf32> to vector<8x128xf32>
    %19 = arith.addf %15, %18 : vector<8x128xf32>
    %cst_17 = arith.constant 0.000000e+00 : f32
    %20 = vector.broadcast %cst_17 : f32 to vector<8x128xf32>
    %21 = arith.maximumf %19, %20 : vector<8x128xf32>
    %22 = arith.truncf %21 : vector<8x128xf32> to vector<8x128xbf16>
    %c1 = arith.constant 1 : index
    %c0_18 = arith.constant 0 : index
    %c0_19 = arith.constant 0 : index
    %23 = vector.load %arg6[%c1, %c0_18, %c0_19] : memref<4x128x128xbf16, #tpu.memory_space<vmem>>, vector<1x128x128xbf16>
    %24 = vector.shape_cast %23 : vector<1x128x128xbf16> to vector<128x128xbf16>
    %cst_20 = arith.constant dense<0.000000e+00> : vector<8x128xf32>
    %25 = tpu.matmul %22, %24, %cst_20 {dimension_numbers = #tpu.dot_dimension_numbers<[1], [0], [0], [1], [0, 0, 1, 1], [], []>} : vector<8x128xbf16>, vector<128x128xbf16>, vector<8x128xf32> -> vector<8x128xf32>
    %c1_21 = arith.constant 1 : index
    %c0_22 = arith.constant 0 : index
    %c0_23 = arith.constant 0 : index
    %26 = vector.load %arg7[%c1_21, %c0_22, %c0_23] : memref<4x1x128xf32, #tpu.memory_space<vmem>>, vector<1x1x128xf32>
    %27 = vector.shape_cast %26 : vector<1x1x128xf32> to vector<1x128xf32>
    %28 = vector.broadcast %27 : vector<1x128xf32> to vector<8x128xf32>
    %29 = arith.addf %25, %28 : vector<8x128xf32>
    %cst_24 = arith.constant 0.000000e+00 : f32
    %30 = vector.broadcast %cst_24 : f32 to vector<8x128xf32>
    %31 = arith.maximumf %29, %30 : vector<8x128xf32>
    %32 = arith.truncf %31 : vector<8x128xf32> to vector<8x128xbf16>
    %c2 = arith.constant 2 : index
    %c0_25 = arith.constant 0 : index
    %c0_26 = arith.constant 0 : index
    %33 = vector.load %arg6[%c2, %c0_25, %c0_26] : memref<4x128x128xbf16, #tpu.memory_space<vmem>>, vector<1x128x128xbf16>
    %34 = vector.shape_cast %33 : vector<1x128x128xbf16> to vector<128x128xbf16>
    %cst_27 = arith.constant dense<0.000000e+00> : vector<8x128xf32>
    %35 = tpu.matmul %32, %34, %cst_27 {dimension_numbers = #tpu.dot_dimension_numbers<[1], [0], [0], [1], [0, 0, 1, 1], [], []>} : vector<8x128xbf16>, vector<128x128xbf16>, vector<8x128xf32> -> vector<8x128xf32>
    %c2_28 = arith.constant 2 : index
    %c0_29 = arith.constant 0 : index
    %c0_30 = arith.constant 0 : index
    %36 = vector.load %arg7[%c2_28, %c0_29, %c0_30] : memref<4x1x128xf32, #tpu.memory_space<vmem>>, vector<1x1x128xf32>
    %37 = vector.shape_cast %36 : vector<1x1x128xf32> to vector<1x128xf32>
    %38 = vector.broadcast %37 : vector<1x128xf32> to vector<8x128xf32>
    %39 = arith.addf %35, %38 : vector<8x128xf32>
    %cst_31 = arith.constant 0.000000e+00 : f32
    %40 = vector.broadcast %cst_31 : f32 to vector<8x128xf32>
    %41 = arith.maximumf %39, %40 : vector<8x128xf32>
    %42 = arith.truncf %41 : vector<8x128xf32> to vector<8x128xbf16>
    %c3 = arith.constant 3 : index
    %c0_32 = arith.constant 0 : index
    %c0_33 = arith.constant 0 : index
    %43 = vector.load %arg6[%c3, %c0_32, %c0_33] : memref<4x128x128xbf16, #tpu.memory_space<vmem>>, vector<1x128x128xbf16>
    %44 = vector.shape_cast %43 : vector<1x128x128xbf16> to vector<128x128xbf16>
    %cst_34 = arith.constant dense<0.000000e+00> : vector<8x128xf32>
    %45 = tpu.matmul %42, %44, %cst_34 {dimension_numbers = #tpu.dot_dimension_numbers<[1], [0], [0], [1], [0, 0, 1, 1], [], []>} : vector<8x128xbf16>, vector<128x128xbf16>, vector<8x128xf32> -> vector<8x128xf32>
    %c3_35 = arith.constant 3 : index
    %c0_36 = arith.constant 0 : index
    %c0_37 = arith.constant 0 : index
    %46 = vector.load %arg7[%c3_35, %c0_36, %c0_37] : memref<4x1x128xf32, #tpu.memory_space<vmem>>, vector<1x1x128xf32>
    %47 = vector.shape_cast %46 : vector<1x1x128xf32> to vector<1x128xf32>
    %48 = vector.broadcast %47 : vector<1x128xf32> to vector<8x128xf32>
    %49 = arith.addf %45, %48 : vector<8x128xf32>
    %cst_38 = arith.constant 0.000000e+00 : f32
    %50 = vector.broadcast %cst_38 : f32 to vector<8x128xf32>
    %51 = arith.maximumf %49, %50 : vector<8x128xf32>
    %52 = arith.truncf %51 : vector<8x128xf32> to vector<8x128xbf16>
    %c0_39 = arith.constant 0 : index
    %c0_40 = arith.constant 0 : index
    %53 = vector.load %arg8[%c0_39, %c0_40] : memref<128x128xbf16, #tpu.memory_space<vmem>>, vector<128x128xbf16>
    %cst_41 = arith.constant dense<0.000000e+00> : vector<8x128xf32>
    %54 = tpu.matmul %52, %53, %cst_41 {dimension_numbers = #tpu.dot_dimension_numbers<[1], [0], [0], [1], [0, 0, 1, 1], [], []>} : vector<8x128xbf16>, vector<128x128xbf16>, vector<8x128xf32> -> vector<8x128xf32>
    %c0_42 = arith.constant 0 : index
    %c0_43 = arith.constant 0 : index
    %55 = vector.load %arg9[%c0_42, %c0_43] : memref<1x128xf32, #tpu.memory_space<vmem>>, vector<1x128xf32>
    %56 = vector.broadcast %55 : vector<1x128xf32> to vector<8x128xf32>
    %57 = arith.addf %54, %56 : vector<8x128xf32>
    %c0_44 = arith.constant 0 : index
    %c0_45 = arith.constant 0 : index
    %58 = vector.load %arg10[%c0_44, %c0_45] : memref<8x128xf32, #tpu.memory_space<vmem>>, vector<8x128xf32>
    tpu.vector_store %arg10[%c0_44, %c0_45], %57 {strides = array<i32>} : memref<8x128xf32, #tpu.memory_space<vmem>>, vector<8x128xf32>,
    return
  }
  func.func @transform_0(%arg0: i32) -> (i32, i32) {
    %c0_i32 = arith.constant 0 : i32
    %c0_i32_0 = arith.constant 0 : i32
    return %arg0, %c0_i32 : i32, i32
  }
  func.func @transform_1(%arg0: i32) -> (i32, i32) {
    %c0_i32 = arith.constant 0 : i32
    %c0_i32_0 = arith.constant 0 : i32
    return %arg0, %c0_i32 : i32, i32
  }
  func.func @transform_2(%arg0: i32) -> (i32, i32) {
    %c0_i32 = arith.constant 0 : i32
    %c0_i32_0 = arith.constant 0 : i32
    %c0_i32_1 = arith.constant 0 : i32
    return %c0_i32, %c0_i32_0 : i32, i32
  }
  func.func @transform_3(%arg0: i32) -> (i32, i32) {
    %c0_i32 = arith.constant 0 : i32
    %c0_i32_0 = arith.constant 0 : i32
    %c0_i32_1 = arith.constant 0 : i32
    return %c0_i32, %c0_i32_0 : i32, i32
  }
  func.func @transform_4(%arg0: i32) -> (i32, i32) {
    %c0_i32 = arith.constant 0 : i32
    %c0_i32_0 = arith.constant 0 : i32
    %c0_i32_1 = arith.constant 0 : i32
    return %c0_i32, %c0_i32_0 : i32, i32
  }
  func.func @transform_5(%arg0: i32) -> (i32, i32, i32) {
    %c0_i32 = arith.constant 0 : i32
    %c0_i32_0 = arith.constant 0 : i32
    %c0_i32_1 = arith.constant 0 : i32
    %c0_i32_2 = arith.constant 0 : i32
    return %c0_i32, %c0_i32_0, %c0_i32_1 : i32, i32, i32
  }
  func.func @transform_6(%arg0: i32) -> (i32, i32, i32) {
    %c0_i32 = arith.constant 0 : i32
    %c0_i32_0 = arith.constant 0 : i32
    %c0_i32_1 = arith.constant 0 : i32
    %c0_i32_2 = arith.constant 0 : i32
    return %c0_i32, %c0_i32_0, %c0_i32_1 : i32, i32, i32
  }
  func.func @transform_7(%arg0: i32) -> (i32, i32) {
    %c0_i32 = arith.constant 0 : i32
    %c0_i32_0 = arith.constant 0 : i32
    %c0_i32_1 = arith.constant 0 : i32
    return %c0_i32, %c0_i32_0 : i32, i32
  }
  func.func @transform_8(%arg0: i32) -> (i32, i32) {
    %c0_i32 = arith.constant 0 : i32
    %c0_i32_0 = arith.constant 0 : i32
    %c0_i32_1 = arith.constant 0 : i32
    return %c0_i32, %c0_i32_0 : i32, i32
  }
  func.func @transform_9(%arg0: i32) -> (i32, i32) {
    %c0_i32 = arith.constant 0 : i32
    %c0_i32_0 = arith.constant 0 : i32
    return %arg0, %c0_i32 : i32, i32
  }
}

</mosaic_0001>

<bundles_post_ra>
// kernel: tpu_custom_call.1
= control target key start
LH: loop header
LB: loop body
LE: loop exit
PB: predicated region body
PF: predicated region fallthrough
CT: control target
= control target key end

     0   :  { %14 = vsyncpa [#allocation3], 0  ;;  %s1269_s0 = inlined_call_operand.vmem [shape: f32[8,2], index: 0, kind: input, shape index: {}]   ;;  %s1270_s1 = inlined_call_operand.vmem [shape: f32[8,2], index: 1, kind: input, shape index: {}]   ;;  %s1271_s2 = inlined_call_operand.vmem [shape: bf16[2,128], index: 2, kind: input, shape index: {}]   ;;  %s1272_s3 = inlined_call_operand.vmem [shape: bf16[2,128], index: 3, kind: input, shape index: {}]   ;;  %s1273_s4 = inlined_call_operand.vmem [shape: f32[1,128], index: 4, kind: input, shape index: {}]   ;;  %s1274_s5 = inlined_call_operand.hbm [shape: bf16[4,128,128], index: 5, kind: input, shape index: {}]   ;;  %s1275_s6 = inlined_call_operand.vmem [shape: f32[4,1,128], index: 6, kind: input, shape index: {}]   ;;  %s1276_s7 = inlined_call_operand.hbm [shape: bf16[128,128], index: 7, kind: input, shape index: {}]   ;;  %s1277_s8 = inlined_call_operand.vmem [shape: f32[1,128], index: 8, kind: input, shape index: {}]   ;;  %s1278_s9 = inlined_call_operand.hbm [shape: f32[8,128], index: 9, kind: output, shape index: {}]  }
   0x1   :  { %15 = vsyncpa [#allocation6], 0 }
   0x2   :  { %16 = vsyncpa [#allocation4], 0  ;;  %s1088_s30 = smov [#allocation2]   ;;  %s1016_s13 = scalar_lea.hbm %s1274_s5, 4096 }
   0x3   :  { %s32_s10 = sshll.u32 %s1088_s30, 4  ;;  %p1017_p0 = scmp.ne.s32.totalorder %s1274_s5, %s1016_s13  ;;  %s33_s10 = int_to_ptr.vmem [resolvable:$true] %s32_s10 }
   0x4   :  { %p1020_p1 = scmp.lt.u32.totalorder %s1016_s13, %s1274_s5 }
   0x6   :  { %p1022_p2 = pnand %p1020_p1, %p1017_p0 }
   0x8   :  { %1025 = shalt.err (!%p1022_p2)
}
   0x9   :  { %s1026_s18 = scalar_lea.vmem %s33_s10, 4096  ;;  %p1031_p4 = scmp.lt.s32.totalorder %s33_s10, %s33_s10 }
   0xa   :  { %p1027_p3 = scmp.ne.s32.totalorder %s33_s10, %s1026_s18  ;;  %p1032_p5 = scmp.lt.s32.totalorder %s1026_s18, %s1026_s18 }
   0xc   :  { %p1033_p6 = por %p1032_p5, %p1031_p4 }
   0xe   :  { %p1034_p7 = pnand %p1033_p6, %p1027_p3 }
  0x10   :  { %1037 = shalt.err (!%p1034_p7)
}
  0x11   :  { %s1089_s19 = smov 64   ;;  %s1090_s20 = smov 4  }
  0x12   :  { %38 = dma.hbm_to_vmem [thread:$0]  %s1274_s5, 4096, %s33_s10, [#allocation3], %s1089_s19, %s1089_s19, %s1090_s20  }
  0x13   :  { %s1091_s23 = smov [#allocation5]   ;;  %s1038_s27 = scalar_lea.hbm %s1276_s7, 1024 }
  0x14   :  { %s46_s24 = sshll.u32 %s1091_s23, 4  ;;  %p1039_p8 = scmp.ne.s32.totalorder %s1276_s7, %s1038_s27  ;;  %s47_s24 = int_to_ptr.vmem [resolvable:$true] %s46_s24 }
  0x15   :  { %p1042_p9 = scmp.lt.u32.totalorder %s1038_s27, %s1276_s7 }
  0x17   :  { %p1044_p10 = pnand %p1042_p9, %p1039_p8 }
  0x19   :  { %1047 = shalt.err (!%p1044_p10)
}
  0x1a   :  { %s1048_s12 = scalar_lea.vmem %s47_s24, 1024  ;;  %p1053_p12 = scmp.lt.s32.totalorder %s47_s24, %s47_s24 }
  0x1b   :  { %p1049_p11 = scmp.ne.s32.totalorder %s47_s24, %s1048_s12  ;;  %p1054_p13 = scmp.lt.s32.totalorder %s1048_s12, %s1048_s12 }
  0x1d   :  { %p1055_p0 = por %p1054_p13, %p1053_p12 }
  0x1f   :  { %p1056_p1 = pnand %p1055_p0, %p1049_p11 }
  0x21   :  { %1059 = shalt.err (!%p1056_p1)
}
  0x22   :  { %52 = dma.hbm_to_vmem [thread:$0]  %s1276_s7, 1024, %s47_s24, [#allocation6], %s1089_s19, %s1089_s19, %s1090_s20  }
  0x23   :  { %1082 = dma.done.wait [#allocation3], 4096  }
  0x24   :  { %1083 = vsyncadd [#allocation3], 4294963200 }
  0x25   :  { %1084 = dma.done.wait [#allocation6], 1024  }
  0x26   :  { %1085 = vsyncadd [#allocation6], 4294966272  ;;  %v1092_v0 = vmov 0.0   ;;  %vm1093_vm0 = vmmov 0   ;;  %vm72_vm1 = vcmask 1040384   ;;  %v65_v3 = vld [vmem:[%s1270_s1] sm:$0xff] }
  0x27   :  { %857 = vmatprep.subr.bf16.mxu1 %v1092_v0  ;;  %859 = vmatprep.mubr.msk.bf16.mxu1 %vm1093_vm0, %v1092_v0  ;;  %v64_v1 = vld [vmem:[%s1271_s2] sm:$0x1]  ;;  %v66_v5 = vpack.c.bf16 %v65_v3, %v65_v3  ;;  %vm68_vm2 = vcmask 15360   ;;  %v977_v8 = vld [vmem:[#allocation2 + $0x8] sm:$0xff]   ;;  %v978_v10 = vld [vmem:[#allocation2 + $0x10] sm:$0xff]   ;;  %s1094_s27 = smov [#allocation7]  }
  0x28   :  { %869 = vmatprep.subr.bf16.mxu0 %v1092_v0  ;;  %885 = vmatprep.mubr.msk.bf16.mxu0 %vm1093_vm0, %v1092_v0  ;;  %v67_v2 = vld [vmem:[%s1272_s3] sm:$0x1]  ;;  %v120_v7 = vsel %vm72_vm1, %v64_v1, 0  ;;  %v979_v12 = vld [vmem:[#allocation2 + $0x18] sm:$0xff]   ;;  %v981_v14 = vld [vmem:[#allocation2 + $0x28] sm:$0xff]   ;;  %s747_s28 = sshll.u32 %s1094_s27, 4  ;;  %s748_s28 = int_to_ptr.vmem [resolvable:$true] %s747_s28 }
  0x29   :  { %v74_v4 = vsel %vm72_vm1, %v67_v2, 0  ;;  %v976_v6 = vld [vmem:[#allocation2] sm:$0xff]   ;;  %v982_v15 = vld [vmem:[#allocation2 + $0x30] sm:$0xff]   ;;  %v983_v16 = vld [vmem:[#allocation2 + $0x38] sm:$0xff]   ;;  %p1065_p3 = scmp.lt.s32.totalorder %s748_s28, %s748_s28 }
  0x2a   :  { %858 = vmatpush3.bf16.msra.mxu1 %v74_v4  ;;  %870 = vmatpush3.bf16.msra.mxu0 %v976_v6  ;;  %v62_v9 = vld [vmem:[%s1269_s0] sm:$0xff]  ;;  %v985_v18 = vld [vmem:[#allocation2 + $0x48] sm:$0xff]   ;;  %v986_v19 = vld [vmem:[#allocation2 + $0x50] sm:$0xff]  }
  0x2b   :  { %863 = vmatprep.subr.bf16.mxu1 %v1092_v0  ;;  %871 = vmatprep.subr.bf16.mxu0 %v1092_v0  ;;  %v63_v11 = vpack.c.bf16 %v62_v9, %v62_v9  ;;  %v980_v13 = vld [vmem:[#allocation2 + $0x20] sm:$0xff]   ;;  %v987_v20 = vld [vmem:[#allocation2 + $0x58] sm:$0xff]   ;;  %v989_v22 = vld [vmem:[#allocation2 + $0x68] sm:$0xff]  }
  0x2c   :  { %v984_v17 = vld [vmem:[#allocation2 + $0x40] sm:$0xff]   ;;  %v990_v35 = vld [vmem:[#allocation2 + $0x70] sm:$0xff]   ;;  %v991_v36 = vld [vmem:[#allocation2 + $0x78] sm:$0xff]  }
  0x2d   :  { %860 = vmatmul.mubr.msk.bf16.vlgmr.msra.gmra.mrb[0].mxu1 %vm68_vm2, %v66_v5  ;;  %v988_v21 = vld [vmem:[#allocation2 + $0x60] sm:$0xff]   ;;  %v993_v38 = vld [vmem:[#allocation2 + $0x88] sm:$0xff]   ;;  %v994_v39 = vld [vmem:[#allocation2 + $0x90] sm:$0xff]  }
  0x2e   :  { %864 = vmatpush3.bf16.msra.mxu1 %v120_v7  ;;  %865 = vmatprep.mubr.msk.bf16.mxu1 %vm1093_vm0, %v1092_v0  ;;  %v759_v28 = vld [vmem:[%s1273_s4] ss:$0 sm:$0xff]  ;;  %v995_v40 = vld [vmem:[#allocation2 + $0x98] sm:$0xff]   ;;  %v997_v42 = vld [vmem:[#allocation2 + $0xa8] sm:$0xff]  }
  0x2f   :  { %872 = vmatpush3.bf16.msra.mxu0 %v977_v8  ;;  %889 = vmatprep.subr.bf16.mxu1 %v1092_v0  ;;  %v992_v37 = vld [vmem:[#allocation2 + $0x80] sm:$0xff]   ;;  %v998_v51 = vld [vmem:[#allocation2 + $0xb0] sm:$0xff]   ;;  %v999_v52 = vld [vmem:[#allocation2 + $0xb8] sm:$0xff]  }
  0x30   :  { %873 = vmatprep.subr.bf16.mxu0 %v1092_v0  ;;  %v996_v41 = vld [vmem:[#allocation2 + $0xa0] sm:$0xff]   ;;  %v1001_v54 = vld [vmem:[#allocation2 + $0xc8] sm:$0xff]   ;;  %v1002_v55 = vld [vmem:[#allocation2 + $0xd0] sm:$0xff]  }
  0x31   :  { %v760_v43 = vld [vmem:[%s1275_s6] ss:$0 sm:$0xff]  ;;  %v1003_v56 = vld [vmem:[#allocation2 + $0xd8] sm:$0xff]   ;;  %v1005_v58 = vld [vmem:[#allocation2 + $0xe8] sm:$0xff]  }
  0x32   :  { %v1000_v53 = vld [vmem:[#allocation2 + $0xc0] sm:$0xff]   ;;  %v1006_v4 = vld [vmem:[#allocation2 + $0xf0] sm:$0xff]   ;;  %v1007_v5 = vld [vmem:[#allocation2 + $0xf8] sm:$0xff]  }
  0x33   :  { %874 = vmatpush3.bf16.msra.mxu0 %v978_v10  ;;  %v1004_v57 = vld [vmem:[#allocation2 + $0xe0] sm:$0xff]   ;;  %v1009_v7 = vld [vmem:[#allocation5 + $0x8] sm:$0xff]   ;;  %v1010_v8 = vld [vmem:[#allocation5 + $0x10] sm:$0xff]  }
  0x34   :  { %875 = vmatprep.subr.bf16.mxu0 %v1092_v0  ;;  %v770_v59 = vld [vmem:[%s1275_s6 + $0x1] ss:$0 sm:$0xff]  ;;  %v1011_v9 = vld [vmem:[#allocation5 + $0x18] sm:$0xff]  }
  0x35   :  { %866 = vmatmul.mubr.msk.bf16.vlgmr.msra.gmra.mrb[4].mxu1 %vm68_vm2, %v63_v11  ;;  %v1008_v6 = vld [vmem:[#allocation5] sm:$0xff]   ;;  %v1013_v11 = vld [vmem:[#allocation5 + $0x28] sm:$0xff]  }
  0x36   :  { %905 = vmatprep.mubr.msk.bf16.mxu1 %vm1093_vm0, %v1092_v0  ;;  %890 = vmatpush3.bf16.msra.mxu1 %v984_v17  ;;  %v1012_v10 = vld [vmem:[#allocation5 + $0x20] sm:$0xff]  }
  0x37   :  { %876 = vmatpush3.bf16.msra.mxu0 %v979_v12  ;;  %891 = vmatprep.subr.bf16.mxu1 %v1092_v0  ;;  %v780_v12 = vld [vmem:[%s1275_s6 + $0x2] ss:$0 sm:$0xff] }
  0x38   :  { %877 = vmatprep.subr.bf16.mxu0 %v1092_v0 }
  0x3a   :  { %892 = vmatpush3.bf16.msra.mxu1 %v985_v18 }
  0x3b   :  { %878 = vmatpush3.bf16.msra.mxu0 %v980_v13  ;;  %893 = vmatprep.subr.bf16.mxu1 %v1092_v0 }
  0x3c   :  { %879 = vmatprep.subr.bf16.mxu0 %v1092_v0 }
  0x3e   :  { %894 = vmatpush3.bf16.msra.mxu1 %v986_v19 }
  0x3f   :  { %880 = vmatpush3.bf16.msra.mxu0 %v981_v14  ;;  %895 = vmatprep.subr.bf16.mxu1 %v1092_v0 }
  0x40   :  { %881 = vmatprep.subr.bf16.mxu0 %v1092_v0 }
  0x42   :  { %896 = vmatpush3.bf16.msra.mxu1 %v987_v20  ;;  %v1014_v20 = vld [vmem:[#allocation5 + $0x30] sm:$0xff]  }
  0x43   :  { %882 = vmatpush3.bf16.msra.mxu0 %v982_v15  ;;  %897 = vmatprep.subr.bf16.mxu1 %v1092_v0 }
  0x44   :  { %883 = vmatprep.subr.bf16.mxu0 %v1092_v0 }
  0x46   :  { %898 = vmatpush3.bf16.msra.mxu1 %v988_v21  ;;  %v1015_v21 = vld [vmem:[#allocation5 + $0x38] sm:$0xff]  }
  0x47   :  { %884 = vmatpush3.bf16.msra.mxu0 %v983_v16  ;;  %899 = vmatprep.subr.bf16.mxu1 %v1092_v0 }
  0x48   :  { %909 = vmatprep.subr.bf16.mxu0 %v1092_v0 }
  0x4a   :  { %900 = vmatpush3.bf16.msra.mxu1 %v989_v22  ;;  %v790_v22 = vld [vmem:[%s1275_s6 + $0x3] ss:$0 sm:$0xff]  ;;  %s1060_s6 = scalar_lea.vmem %s748_s28, 128 }
  0x4b   :  { %901 = vmatprep.subr.bf16.mxu1 %v1092_v0  ;;  %p1061_p2 = scmp.ne.s32.totalorder %s748_s28, %s1060_s6  ;;  %p1066_p4 = scmp.lt.s32.totalorder %s1060_s6, %s1060_s6 }
  0x4d   :  { %p1067_p5 = por %p1066_p4, %p1065_p3 }
  0x4e   :  { %902 = vmatpush3.bf16.msra.mxu1 %v990_v35 }
  0x4f   :  { %903 = vmatprep.subr.bf16.mxu1 %v1092_v0  ;;  %p1068_p6 = pnand %p1067_p5, %p1061_p2 }
  0x52   :  { %904 = vmatpush3.bf16.msra.mxu1 %v991_v36 }
  0x53   :  { %929 = vmatprep.subr.bf16.mxu1 %v1092_v0 }
 0x100   :  { %v110_v23 = vpop.f32.mrb[0].mxu1 }
 0x101   :  { %v861_v24 = vpop.f32.mrb[1].mxu1 }
 0x102   :  { %v113_v25 = vpop.f32.mrb[2].mxu1 }
 0x103   :  { %v862_v26 = vpop.f32.mrb[3].mxu1 }
 0x108   :  { %v156_v27 = vpop.f32.mrb[4].mxu1 }
 0x109   :  { %v157_v29 = vadd.f32 %v156_v27, %v110_v23  ;;  %v867_v30 = vpop.f32.mrb[5].mxu1 }
 0x10a   :  { %v159_v31 = vpop.f32.mrb[6].mxu1  ;;  %v799_v30 = vld [vmem:[%s1277_s8] ss:$0 sm:$0xff] }
 0x10b   :  { %v169_v32 = vadd.f32 %v759_v28, %v157_v29  ;;  %v868_v33 = vpop.f32.mrb[7].mxu1 }
 0x10d   :  { %v170_v34 = vpack.c.bf16 %v169_v32, %v169_v32 }
 0x10f   :  { %886 = vmatmul.mubr.bf16.vlgmr.msra.gmra.mrb[0].mxu0 %v170_v34 }
 0x110   :  { %925 = vmatprep.mubr.msk.bf16.mxu0 %vm1093_vm0, %v1092_v0  ;;  %910 = vmatpush3.bf16.msra.mxu0 %v992_v37 }
 0x111   :  { %911 = vmatprep.subr.bf16.mxu0 %v1092_v0 }
 0x114   :  { %912 = vmatpush3.bf16.msra.mxu0 %v993_v38 }
 0x115   :  { %913 = vmatprep.subr.bf16.mxu0 %v1092_v0 }
 0x118   :  { %914 = vmatpush3.bf16.msra.mxu0 %v994_v39 }
 0x119   :  { %915 = vmatprep.subr.bf16.mxu0 %v1092_v0 }
 0x11c   :  { %916 = vmatpush3.bf16.msra.mxu0 %v995_v40 }
 0x11d   :  { %917 = vmatprep.subr.bf16.mxu0 %v1092_v0 }
 0x120   :  { %918 = vmatpush3.bf16.msra.mxu0 %v996_v41 }
 0x121   :  { %919 = vmatprep.subr.bf16.mxu0 %v1092_v0 }
 0x124   :  { %920 = vmatpush3.bf16.msra.mxu0 %v997_v42 }
 0x125   :  { %921 = vmatprep.subr.bf16.mxu0 %v1092_v0 }
 0x128   :  { %922 = vmatpush3.bf16.msra.mxu0 %v998_v51 }
 0x129   :  { %923 = vmatprep.subr.bf16.mxu0 %v1092_v0 }
 0x12c   :  { %924 = vmatpush3.bf16.msra.mxu0 %v999_v52 }
 0x12d   :  { %949 = vmatprep.subr.bf16.mxu0 %v1092_v0 }
 0x1e2   :  { %v276_v44 = vpop.f32.mrb[0].mxu0 }
 0x1e3   :  { %v277_v45 = vadd.f32 %v760_v43, %v276_v44  ;;  %v887_v46 = vpop.f32.mrb[1].mxu0 }
 0x1e4   :  { %v279_v47 = vpop.f32.mrb[2].mxu0 }
 0x1e5   :  { %v282_v48 = vmax.f32 %v277_v45, 0.0  ;;  %v888_v49 = vpop.f32.mrb[3].mxu0 }
 0x1e7   :  { %v283_v50 = vpack.c.bf16 %v282_v48, %v282_v48 }
 0x1e9   :  { %906 = vmatmul.mubr.bf16.vlgmr.msra.gmra.mrb[8].mxu1 %v283_v50 }
 0x1ea   :  { %945 = vmatprep.mubr.msk.bf16.mxu1 %vm1093_vm0, %v1092_v0  ;;  %930 = vmatpush3.bf16.msra.mxu1 %v1000_v53 }
 0x1eb   :  { %931 = vmatprep.subr.bf16.mxu1 %v1092_v0 }
 0x1ee   :  { %932 = vmatpush3.bf16.msra.mxu1 %v1001_v54 }
 0x1ef   :  { %933 = vmatprep.subr.bf16.mxu1 %v1092_v0 }
 0x1f2   :  { %934 = vmatpush3.bf16.msra.mxu1 %v1002_v55 }
 0x1f3   :  { %935 = vmatprep.subr.bf16.mxu1 %v1092_v0 }
 0x1f6   :  { %936 = vmatpush3.bf16.msra.mxu1 %v1003_v56 }
 0x1f7   :  { %937 = vmatprep.subr.bf16.mxu1 %v1092_v0 }
 0x1fa   :  { %938 = vmatpush3.bf16.msra.mxu1 %v1004_v57 }
 0x1fb   :  { %939 = vmatprep.subr.bf16.mxu1 %v1092_v0 }
 0x1fe   :  { %940 = vmatpush3.bf16.msra.mxu1 %v1005_v58 }
 0x1ff   :  { %941 = vmatprep.subr.bf16.mxu1 %v1092_v0 }
 0x202   :  { %942 = vmatpush3.bf16.msra.mxu1 %v1006_v4 }
 0x203   :  { %943 = vmatprep.subr.bf16.mxu1 %v1092_v0 }
 0x206   :  { %944 = vmatpush3.bf16.msra.mxu1 %v1007_v5 }
 0x2bc   :  { %v391_v60 = vpop.f32.mrb[8].mxu1 }
 0x2bd   :  { %v392_v61 = vadd.f32 %v770_v59, %v391_v60  ;;  %v907_v62 = vpop.f32.mrb[9].mxu1 }
 0x2be   :  { %v394_v63 = vpop.f32.mrb[10].mxu1 }
 0x2bf   :  { %v397_v1 = vmax.f32 %v392_v61, 0.0  ;;  %v908_v2 = vpop.f32.mrb[11].mxu1 }
 0x2c1   :  { %v398_v3 = vpack.c.bf16 %v397_v1, %v397_v1 }
 0x2c3   :  { %926 = vmatmul.mubr.bf16.vlgmr.msra.gmra.mrb[4].mxu0 %v398_v3 }
 0x2c4   :  { %965 = vmatprep.mubr.msk.bf16.mxu0 %vm1093_vm0, %v1092_v0  ;;  %950 = vmatpush3.bf16.msra.mxu0 %v1008_v6 }
 0x2c5   :  { %951 = vmatprep.subr.bf16.mxu0 %v1092_v0 }
 0x2c8   :  { %952 = vmatpush3.bf16.msra.mxu0 %v1009_v7 }
 0x2c9   :  { %953 = vmatprep.subr.bf16.mxu0 %v1092_v0 }
 0x2cc   :  { %954 = vmatpush3.bf16.msra.mxu0 %v1010_v8 }
 0x2cd   :  { %955 = vmatprep.subr.bf16.mxu0 %v1092_v0 }
 0x2d0   :  { %956 = vmatpush3.bf16.msra.mxu0 %v1011_v9 }
 0x2d1   :  { %957 = vmatprep.subr.bf16.mxu0 %v1092_v0 }
 0x2d4   :  { %958 = vmatpush3.bf16.msra.mxu0 %v1012_v10 }
 0x2d5   :  { %959 = vmatprep.subr.bf16.mxu0 %v1092_v0 }
 0x2d8   :  { %960 = vmatpush3.bf16.msra.mxu0 %v1013_v11 }
 0x2d9   :  { %961 = vmatprep.subr.bf16.mxu0 %v1092_v0 }
 0x2dc   :  { %962 = vmatpush3.bf16.msra.mxu0 %v1014_v20 }
 0x2dd   :  { %963 = vmatprep.subr.bf16.mxu0 %v1092_v0 }
 0x2e0   :  { %964 = vmatpush3.bf16.msra.mxu0 %v1015_v21 }
 0x396   :  { %v506_v13 = vpop.f32.mrb[4].mxu0 }
 0x397   :  { %v507_v14 = vadd.f32 %v780_v12, %v506_v13  ;;  %v927_v15 = vpop.f32.mrb[5].mxu0 }
 0x398   :  { %v509_v16 = vpop.f32.mrb[6].mxu0 }
 0x399   :  { %v512_v17 = vmax.f32 %v507_v14, 0.0  ;;  %v928_v18 = vpop.f32.mrb[7].mxu0 }
 0x39b   :  { %v513_v19 = vpack.c.bf16 %v512_v17, %v512_v17 }
 0x39d   :  { %946 = vmatmul.mubr.bf16.vlgmr.msra.gmra.mrb[12].mxu1 %v513_v19 }
 0x470   :  { %v621_v23 = vpop.f32.mrb[12].mxu1 }
 0x471   :  { %v622_v24 = vadd.f32 %v790_v22, %v621_v23  ;;  %v947_v25 = vpop.f32.mrb[13].mxu1 }
 0x472   :  { %v624_v26 = vpop.f32.mrb[14].mxu1 }
 0x473   :  { %v627_v27 = vmax.f32 %v622_v24, 0.0  ;;  %v948_v28 = vpop.f32.mrb[15].mxu1 }
 0x475   :  { %v628_v29 = vpack.c.bf16 %v627_v27, %v627_v27 }
 0x477   :  { %966 = vmatmul.mubr.bf16.vlgmr.msra.gmra.mrb[8].mxu0 %v628_v29 }
 0x54a   :  { %v734_v0 = vpop.f32.mrb[8].mxu0 }
 0x54b   :  { %v735_v31 = vadd.f32 %v799_v30, %v734_v0  ;;  %v967_v32 = vpop.f32.mrb[9].mxu0 }
 0x54c   :  { %v737_v33 = vpop.f32.mrb[10].mxu0 }
 0x54d   :  { %740 = vst [vmem:[#allocation7] sm:$0xff] %v735_v31  ;;  %v968_v34 = vpop.f32.mrb[11].mxu0 }
 0x54e   :  { %1071 = shalt.err (!%p1068_p6)
}
 0x54f   :  { %s1072_s8 = scalar_lea.hbm %s1278_s9, 128 }
 0x550   :  { %p1073_p7 = scmp.ne.s32.totalorder %s1278_s9, %s1072_s8  ;;  %p1076_p8 = scmp.lt.u32.totalorder %s1072_s8, %s1278_s9 }
 0x552   :  { %p1078_p9 = pnand %p1076_p8, %p1073_p7 }
 0x554   :  { %1081 = shalt.err (!%p1078_p9)
}
 0x555   :  { %750 = dma.vmem_to_hbm [thread:$0]  %s748_s28, 128, %s1278_s9, [#allocation4]  }
 0x556   :  { %1086 = dma.done.wait [#allocation4], 128  }
 0x557   :  { %1087 = vsyncadd [#allocation4], 4294967168 }
 0x558   :  { %754 = vsyncpa [#allocation3], 1 }
 0x559   :  { %755 = vsyncpa [#allocation6], 1 }
 0x55a   :  { %756 = vsyncpa [#allocation4], 1 }

</bundles_post_ra>
